<compile_context>
chip_gen: v6e
topology: v6e:2x2x1
jax: 0.10.0
libtpu: 0.0.40
codegen_flags: <defaults>
</compile_context>

<pallas_src>
import jax
import jax.numpy as jnp
from jax import lax
from jax.experimental import pallas as pl
from jax.experimental.pallas import tpu as pltpu

N_IN, C_IN, H_IN, W_IN = 2, 3, 16, 16
C_OUT = 64
KH = KW = 7
STRIDE = 2
PAD = 3
H1 = (H_IN + 2 * PAD - KH) // STRIDE + 1        # 8  (conv output)
W1 = (W_IN + 2 * PAD - KW) // STRIDE + 1        # 8
H2 = (H1 + 2 * 1 - 3) // 2 + 1                  # 4  (maxpool output)
W2 = (W1 + 2 * 1 - 3) // 2 + 1                  # 4
K_RAW = KH * KW * C_IN                          # 147
K_PAD = 256                                     # padded contraction dim
BN_EPS = 1e-5


def _res_stem_kernel(p_ref, w_ref, g_ref, b_ref, o_ref):
    m = p_ref.shape[0]            # n * H1 * W1   (rows of the im2col matrix)
    nh2 = o_ref.shape[0]          # n * H2
    blk = nh2 * W2                # rows per (p_h, p_w) parity block

    # ---- Conv2d(3,64,7,s2,p3): one bf16 MXU matmul, f32 accumulation.
    # Conv bias is omitted: (conv+b) - mean(conv+b) == conv - mean(conv) and
    # the variance is unchanged, so training-mode BN makes it exactly cancel.
    conv = jnp.dot(p_ref[...], w_ref[...], preferred_element_type=jnp.float32)

    # ---- BatchNorm2d (training-mode batch stats), one-pass statistics,
    # affine folded to scale/shift, ReLU fused into the same elementwise pass.
    inv_m = 1.0 / m
    mean = jnp.sum(conv, axis=0, keepdims=True) * inv_m          # (1, C)
    ex2 = jnp.sum(conv * conv, axis=0, keepdims=True) * inv_m    # (1, C)
    var = ex2 - mean * mean
    scale = lax.rsqrt(var + BN_EPS) * g_ref[...]                 # (1, C)
    shift = b_ref[...] - mean * scale                            # (1, C)
    y = jnp.maximum(conv * scale + shift, 0.0)                   # (m, C), >= 0

    # ---- MaxPool2d(3, s2, p1), vectorized.
    # Rows were permuted by the wrapper to (p_h, p_w, j, n, i) with
    # h = 2i + p_h, w = 2j + p_w, so every pooling tap is a full-width row
    # shift; zero borders are valid because y >= 0 after ReLU.
    b00 = y[0 * blk:1 * blk, :]          # (h=2i,   w=2j)
    b01 = y[1 * blk:2 * blk, :]          # (h=2i,   w=2j+1)
    b10 = y[2 * blk:3 * blk, :]          # (h=2i+1, w=2j)
    b11 = y[3 * blk:4 * blk, :]          # (h=2i+1, w=2j+1)

    zj = jnp.zeros((nh2, C_OUT), jnp.float32)

    def wshift(x):                       # value at w = 2j-1 (zero for j == 0)
        return jnp.concatenate([zj, x[:-nh2, :]], axis=0)

    re_ = jnp.maximum(jnp.maximum(b00, b01), wshift(b01))   # row-pool, even h
    ro_ = jnp.maximum(jnp.maximum(b10, b11), wshift(b11))   # row-pool, odd  h

    # value at h = 2i-1: shift ro_ down one row, zero the i == 0 rows.
    ridx = lax.broadcasted_iota(jnp.int32, (blk, C_OUT), 0)
    z1 = jnp.zeros((1, C_OUT), jnp.float32)
    ro_up = jnp.where(ridx % H2 == 0, 0.0,
                      jnp.concatenate([z1, ro_[:-1, :]], axis=0))

    pooled = jnp.maximum(jnp.maximum(re_, ro_), ro_up)       # rows = (j, n, i)

    # ---- single lane-dense store: (n*H2, W2*C_OUT), rows (n, i), lanes (j, c)
    o_ref[...] = jnp.concatenate(
        [pooled[j * nh2:(j + 1) * nh2, :] for j in range(W2)], axis=1)


@jax.jit
def res_stem_forward(x_nchw, w_oihw, bias, gamma, beta):
    del bias  # cancels exactly under training-mode BatchNorm (see kernel note)
    n = x_nchw.shape[0]

    # im2col glue (XLA-side, fused under this jit with the pallas_call).
    x = jnp.transpose(x_nchw, (0, 2, 3, 1)).astype(jnp.float32)  # NCHW -> NHWC
    xp = jnp.pad(x, ((0, 0), (PAD, PAD), (PAD, PAD), (0, 0)))
    cols = []
    for kh in range(KH):
        for kw in range(KW):
            cols.append(xp[:, kh:kh + STRIDE * H1:STRIDE,
                           kw:kw + STRIDE * W1:STRIDE, :])
    pat = jnp.concatenate(cols, axis=-1)          # (n, H1, W1, 147), K=(kh,kw,c)

    # Row permutation (p_h, p_w, j, n, i) so the in-kernel maxpool is pure
    # row shifts and the output comes out lane-dense.
    pat = pat.reshape(n, H2, 2, W2, 2, K_RAW).transpose(2, 4, 3, 0, 1, 5)
    pat = pat.reshape(n * H1 * W1, K_RAW)
    patches = jnp.pad(pat, ((0, 0), (0, K_PAD - K_RAW))).astype(jnp.bfloat16)

    # OIHW -> (kh, kw, c_in, c_out) -> (K, C_OUT), matching patch K ordering.
    w_mat = jnp.transpose(w_oihw, (2, 3, 1, 0)).reshape(K_RAW, C_OUT)
    w_mat = jnp.pad(w_mat, ((0, K_PAD - K_RAW), (0, 0))).astype(jnp.bfloat16)

    out2d = pl.pallas_call(
        _res_stem_kernel,
        out_shape=jax.ShapeDtypeStruct((n * H2, W2 * C_OUT), jnp.float32),
        in_specs=[pl.BlockSpec(memory_space=pltpu.MemorySpace.VMEM)] * 4,
        out_specs=pl.BlockSpec(memory_space=pltpu.MemorySpace.VMEM),
    )(patches, w_mat,
      gamma.reshape(1, C_OUT).astype(jnp.float32),
      beta.reshape(1, C_OUT).astype(jnp.float32))

    # (n*H2, W2*C) with rows (n, i), lanes (j, c)  ->  NHWC -> NCHW
    return jnp.transpose(out2d.reshape(n, H2, W2, C_OUT), (0, 3, 1, 2))


def res_stem_reference(x_nchw, w_oihw, bias, gamma, beta):
    conv = lax.conv_general_dilated(
        x_nchw, w_oihw, window_strides=(STRIDE, STRIDE),
        padding=((PAD, PAD), (PAD, PAD)),
        dimension_numbers=('NCHW', 'OIHW', 'NCHW')) + bias.reshape(1, -1, 1, 1)
    mean = jnp.mean(conv, axis=(0, 2, 3), keepdims=True)
    var = jnp.mean(jnp.square(conv - mean), axis=(0, 2, 3), keepdims=True)
    y = ((conv - mean) * lax.rsqrt(var + BN_EPS)
         * gamma.reshape(1, -1, 1, 1) + beta.reshape(1, -1, 1, 1))
    y = jnp.maximum(y, 0.0)
    return lax.reduce_window(
        y, -jnp.inf, lax.max,
        window_dimensions=(1, 1, 3, 3), window_strides=(1, 1, 2, 2),
        padding=((0, 0), (0, 0), (1, 1), (1, 1)))


if __name__ == "__main__":
    key = jax.random.PRNGKey(0)
    kx, kw, kb = jax.random.split(key, 3)
    x = jax.random.normal(kx, (N_IN, C_IN, H_IN, W_IN), dtype=jnp.float32)
    w = jax.random.normal(kw, (C_OUT, C_IN, KH, KW), dtype=jnp.float32) * 0.05
    b = jax.random.normal(kb, (C_OUT,), dtype=jnp.float32) * 0.01
    gamma = jnp.ones((C_OUT,), jnp.float32)   # nn.BatchNorm2d default affine
    beta = jnp.zeros((C_OUT,), jnp.float32)

    out = jax.block_until_ready(res_stem_forward(x, w, b, gamma, beta))

    ref = res_stem_reference(x, w, b, gamma, beta)
    assert out.shape == (N_IN, C_OUT, H2, W2), out.shape
    assert bool(jnp.all(jnp.isfinite(out)))
    err = float(jnp.max(jnp.abs(out - ref)))
    assert bool(jnp.allclose(out, ref, atol=5e-2, rtol=5e-2)), err
    print("KERNEL_OK")
</pallas_src>

<mosaic_0001>
module attributes {stable_mosaic.version = 11 : i64} {
  func.func @_res_stem_kernel(%arg0: memref<128x256xbf16, #tpu.memory_space<vmem>>, %arg1: memref<256x64xbf16, #tpu.memory_space<vmem>>, %arg2: memref<1x64xf32, #tpu.memory_space<vmem>>, %arg3: memref<1x64xf32, #tpu.memory_space<vmem>>, %arg4: memref<8x256xf32, #tpu.memory_space<vmem>>) attributes {dimension_semantics = [], scalar_prefetch = 0 : i64, scratch_operands = 0 : i64, tpu.core_type = #tpu.core_type<tc>} {
    %c0 = arith.constant 0 : index
    %c0_0 = arith.constant 0 : index
    %0 = vector.load %arg0[%c0, %c0_0] : memref<128x256xbf16, #tpu.memory_space<vmem>>, vector<128x256xbf16>
    %c0_1 = arith.constant 0 : index
    %c0_2 = arith.constant 0 : index
    %1 = vector.load %arg1[%c0_1, %c0_2] : memref<256x64xbf16, #tpu.memory_space<vmem>>, vector<256x64xbf16>
    %cst = arith.constant dense<0.000000e+00> : vector<128x64xf32>
    %2 = tpu.matmul %0, %1, %cst {dimension_numbers = #tpu.dot_dimension_numbers<[1], [0], [0], [1], [0, 0, 1, 1], [], []>} : vector<128x256xbf16>, vector<256x64xbf16>, vector<128x64xf32> -> vector<128x64xf32>
    %cst_3 = arith.constant dense<0.000000e+00> : vector<64xf32>
    %3 = vector.multi_reduction <add>, %2, %cst_3 [0] : vector<128x64xf32> to vector<64xf32>
    %4 = vector.shape_cast %3 : vector<64xf32> to vector<1x64xf32>
    %cst_4 = arith.constant 7.812500e-03 : f32
    %5 = vector.broadcast %cst_4 : f32 to vector<1x64xf32>
    %6 = arith.mulf %4, %5 : vector<1x64xf32>
    %7 = arith.mulf %2, %2 : vector<128x64xf32>
    %cst_5 = arith.constant dense<0.000000e+00> : vector<64xf32>
    %8 = vector.multi_reduction <add>, %7, %cst_5 [0] : vector<128x64xf32> to vector<64xf32>
    %9 = vector.shape_cast %8 : vector<64xf32> to vector<1x64xf32>
    %cst_6 = arith.constant 7.812500e-03 : f32
    %10 = vector.broadcast %cst_6 : f32 to vector<1x64xf32>
    %11 = arith.mulf %9, %10 : vector<1x64xf32>
    %12 = arith.mulf %6, %6 : vector<1x64xf32>
    %13 = arith.subf %11, %12 : vector<1x64xf32>
    %cst_7 = arith.constant 9.99999974E-6 : f32
    %14 = vector.broadcast %cst_7 : f32 to vector<1x64xf32>
    %15 = arith.addf %13, %14 : vector<1x64xf32>
    %16 = math.rsqrt %15 : vector<1x64xf32>
    %c0_8 = arith.constant 0 : index
    %c0_9 = arith.constant 0 : index
    %17 = vector.load %arg2[%c0_8, %c0_9] : memref<1x64xf32, #tpu.memory_space<vmem>>, vector<1x64xf32>
    %18 = arith.mulf %16, %17 : vector<1x64xf32>
    %c0_10 = arith.constant 0 : index
    %c0_11 = arith.constant 0 : index
    %19 = vector.load %arg3[%c0_10, %c0_11] : memref<1x64xf32, #tpu.memory_space<vmem>>, vector<1x64xf32>
    %20 = arith.mulf %6, %18 : vector<1x64xf32>
    %21 = arith.subf %19, %20 : vector<1x64xf32>
    %22 = vector.broadcast %18 : vector<1x64xf32> to vector<128x64xf32>
    %23 = arith.mulf %2, %22 : vector<128x64xf32>
    %24 = vector.broadcast %21 : vector<1x64xf32> to vector<128x64xf32>
    %25 = arith.addf %23, %24 : vector<128x64xf32>
    %cst_12 = arith.constant 0.000000e+00 : f32
    %26 = vector.broadcast %cst_12 : f32 to vector<128x64xf32>
    %27 = arith.maximumf %25, %26 : vector<128x64xf32>
    %28 = vector.extract_strided_slice %27 {offsets = [0, 0], sizes = [32, 64], strides = [1, 1]} : vector<128x64xf32> to vector<32x64xf32>
    %29 = vector.extract_strided_slice %27 {offsets = [32, 0], sizes = [32, 64], strides = [1, 1]} : vector<128x64xf32> to vector<32x64xf32>
    %30 = vector.extract_strided_slice %27 {offsets = [64, 0], sizes = [32, 64], strides = [1, 1]} : vector<128x64xf32> to vector<32x64xf32>
    %31 = vector.extract_strided_slice %27 {offsets = [96, 0], sizes = [32, 64], strides = [1, 1]} : vector<128x64xf32> to vector<32x64xf32>
    %cst_13 = arith.constant 0.000000e+00 : f32
    %32 = vector.broadcast %cst_13 : f32 to vector<8x64xf32>
    %33 = arith.maximumf %28, %29 : vector<32x64xf32>
    %34 = vector.extract_strided_slice %29 {offsets = [0, 0], sizes = [24, 64], strides = [1, 1]} : vector<32x64xf32> to vector<24x64xf32>
    %35 = tpu.concatenate %32, %34 in 0 : vector<8x64xf32>, vector<24x64xf32> -> vector<32x64xf32>
    %36 = arith.maximumf %33, %35 : vector<32x64xf32>
    %37 = arith.maximumf %30, %31 : vector<32x64xf32>
    %38 = vector.extract_strided_slice %31 {offsets = [0, 0], sizes = [24, 64], strides = [1, 1]} : vector<32x64xf32> to vector<24x64xf32>
    %39 = tpu.concatenate %32, %38 in 0 : vector<8x64xf32>, vector<24x64xf32> -> vector<32x64xf32>
    %40 = arith.maximumf %37, %39 : vector<32x64xf32>
    %41 = tpu.iota {dimensions = array<i32: 0>} : vector<32x64xi32>
    %cst_14 = arith.constant 0.000000e+00 : f32
    %42 = vector.broadcast %cst_14 : f32 to vector<1x64xf32>
    %c4_i32 = arith.constant 4 : i32
    %c0_i32 = arith.constant 0 : i32
    %43 = arith.cmpi eq, %c4_i32, %c0_i32 : i32
    %c1_i32 = arith.constant 1 : i32
    %44 = arith.select %43, %c1_i32, %c4_i32 : i32
    %45 = vector.broadcast %44 : i32 to vector<32x64xi32>
    %46 = arith.remsi %41, %45 : vector<32x64xi32>
    %c0_i32_15 = arith.constant 0 : i32
    %47 = vector.broadcast %c0_i32_15 : i32 to vector<32x64xi32>
    %48 = arith.cmpi ne, %46, %47 : vector<32x64xi32>
    %c0_i32_16 = arith.constant 0 : i32
    %49 = vector.broadcast %c0_i32_16 : i32 to vector<32x64xi32>
    %50 = arith.cmpi slt, %46, %49 : vector<32x64xi32>
    %c0_i32_17 = arith.constant 0 : i32
    %51 = arith.cmpi slt, %44, %c0_i32_17 : i32
    %52 = vector.broadcast %51 : i1 to vector<32x64xi1>
    %53 = vector.broadcast %52 : vector<32x64xi1> to vector<32x64xi1>
    %54 = arith.xori %50, %53 : vector<32x64xi1>
    %55 = arith.andi %54, %48 : vector<32x64xi1>
    %56 = vector.broadcast %44 : i32 to vector<32x64xi32>
    %57 = arith.addi %46, %56 : vector<32x64xi32>
    %58 = arith.select %55, %57, %46 : vector<32x64xi1>, vector<32x64xi32>
    %c0_i32_18 = arith.constant 0 : i32
    %59 = vector.broadcast %c0_i32_18 : i32 to vector<32x64xi32>
    %60 = arith.cmpi eq, %58, %59 : vector<32x64xi32>
    %61 = vector.extract_strided_slice %40 {offsets = [0, 0], sizes = [31, 64], strides = [1, 1]} : vector<32x64xf32> to vector<31x64xf32>
    %62 = tpu.concatenate %42, %61 in 0 : vector<1x64xf32>, vector<31x64xf32> -> vector<32x64xf32>
    %cst_19 = arith.constant 0.000000e+00 : f32
    %63 = vector.broadcast %cst_19 : f32 to vector<32x64xf32>
    %64 = arith.select %60, %63, %62 : vector<32x64xi1>, vector<32x64xf32>
    %65 = arith.maximumf %36, %40 : vector<32x64xf32>
    %66 = arith.maximumf %65, %64 : vector<32x64xf32>
    %67 = vector.extract_strided_slice %66 {offsets = [0, 0], sizes = [8, 64], strides = [1, 1]} : vector<32x64xf32> to vector<8x64xf32>
    %68 = vector.extract_strided_slice %66 {offsets = [8, 0], sizes = [8, 64], strides = [1, 1]} : vector<32x64xf32> to vector<8x64xf32>
    %69 = vector.extract_strided_slice %66 {offsets = [16, 0], sizes = [8, 64], strides = [1, 1]} : vector<32x64xf32> to vector<8x64xf32>
    %70 = vector.extract_strided_slice %66 {offsets = [24, 0], sizes = [8, 64], strides = [1, 1]} : vector<32x64xf32> to vector<8x64xf32>
    %71 = tpu.concatenate %67, %68, %69, %70 in 1 : vector<8x64xf32>, vector<8x64xf32>, vector<8x64xf32>, vector<8x64xf32> -> vector<8x256xf32>
    %c0_20 = arith.constant 0 : index
    %c0_21 = arith.constant 0 : index
    %72 = vector.load %arg4[%c0_20, %c0_21] : memref<8x256xf32, #tpu.memory_space<vmem>>, vector<8x256xf32>
    tpu.vector_store %arg4[%c0_20, %c0_21], %71 {strides = array<i32>} : memref<8x256xf32, #tpu.memory_space<vmem>>, vector<8x256xf32>,
    return
  }
}

</mosaic_0001>

<bundles_post_ra>
// kernel: res_stem_forward.1
= control target key start
LH: loop header
LB: loop body
LE: loop exit
PB: predicated region body
PF: predicated region fallthrough
CT: control target
= control target key end

     0   :  { %vm339_vm0 = vcmask 523264   ;;  %vm576_vm1 = vcmask 1040384   ;;  %s1084_s1 = inlined_call_operand.vmem [shape: bf16[256,64], index: 1, kind: input, shape index: {}]   ;;  %s1085_s0 = inlined_call_operand.vmem [shape: bf16[128,256], index: 0, kind: input, shape index: {}]   ;;  %s1086_s2 = inlined_call_operand.vmem [shape: f32[1,64], index: 2, kind: input, shape index: {}]   ;;  %s1087_s3 = inlined_call_operand.vmem [shape: f32[1,64], index: 3, kind: input, shape index: {}]   ;;  %s1088_s4 = inlined_call_operand.vmem [shape: f32[8,256], index: 4, kind: output, shape index: {}]  }
   0x1   :  { %v730_v0 = vld [vmem:[%s1084_s1 + $0x78] sm:$0xff]   ;;  %v732_v2 = vld [vmem:[%s1084_s1 + $0x70] sm:$0xff]   ;;  %v734_v4 = vld [vmem:[%s1084_s1 + $0x68] sm:$0xff]  }
   0x2   :  { %v731_v1 = vld [vmem:[%s1084_s1 + $0x38] sm:$0xff]   ;;  %649 = vmatprep.subr.bf16.mxu0 %v730_v0  ;;  %713 = vmatprep.subr.bf16.mxu1 %v730_v0  ;;  %v733_v3 = vld [vmem:[%s1084_s1 + $0x30] sm:$0xff]   ;;  %v735_v5 = vld [vmem:[%s1084_s1 + $0x28] sm:$0xff]  }
   0x3   :  { %650 = vmatpush3.bf16.msra.mxu0 %v731_v1  ;;  %721 = vmatpush3.bf16.msra.mxu1 %v731_v1  ;;  %v736_v6 = vld [vmem:[%s1084_s1 + $0x60] sm:$0xff]   ;;  %v738_v8 = vld [vmem:[%s1084_s1 + $0x58] sm:$0xff]   ;;  %v740_v10 = vld [vmem:[%s1084_s1 + $0x50] sm:$0xff]  }
   0x4   :  { %651 = vmatprep.subr.bf16.mxu0 %v732_v2  ;;  %714 = vmatprep.subr.bf16.mxu1 %v732_v2  ;;  %v737_v7 = vld [vmem:[%s1084_s1 + $0x20] sm:$0xff]   ;;  %v739_v9 = vld [vmem:[%s1084_s1 + $0x18] sm:$0xff]   ;;  %v741_v12 = vld [vmem:[%s1084_s1 + $0x10] sm:$0xff]  }
   0x5   :  { %v748_v11 = vld [vmem:[%s1085_s0 + $0x4] ss:$8 sps:$4 sm:$0xff]   ;;  %v746_v18 = vld [vmem:[%s1085_s0] ss:$8 sps:$4 sm:$0xff]   ;;  %v749_v20 = vld [vmem:[%s1085_s0 + $0x14] ss:$8 sps:$4 sm:$0xff]  }
   0x6   :  { %v754_v13 = vld [vmem:[%s1085_s0 + $0x44] ss:$8 sps:$4 sm:$0xff]   ;;  %274 = vmatprep.mubr.bf16.mxu0 %v748_v11  ;;  %v752_v19 = vld [vmem:[%s1085_s0 + $0x40] ss:$8 sps:$4 sm:$0xff]   ;;  %v758_v21 = vld [vmem:[%s1085_s0 + $0x54] ss:$8 sps:$4 sm:$0xff]  }
   0x7   :  { %652 = vmatpush3.bf16.msra.mxu0 %v733_v3  ;;  %722 = vmatpush3.bf16.msra.mxu1 %v733_v3  ;;  %v742_v14 = vld [vmem:[%s1084_s1 + $0x48] sm:$0xff]   ;;  %v744_v16 = vld [vmem:[%s1084_s1 + $0x40] sm:$0xff]   ;;  %v751_v22 = vld [vmem:[%s1085_s0 + $0x10] ss:$8 sps:$4 sm:$0xff]  }
   0x8   :  { %653 = vmatprep.subr.bf16.mxu0 %v734_v4  ;;  %715 = vmatprep.subr.bf16.mxu1 %v734_v4  ;;  %v743_v15 = vld [vmem:[%s1084_s1 + $0x8] sm:$0xff]   ;;  %v745_v17 = vld [vmem:[%s1084_s1] sm:$0xff]   ;;  %v760_v23 = vld [vmem:[%s1085_s0 + $0x50] ss:$8 sps:$4 sm:$0xff]  }
   0x9   :  { %306 = vmatprep.mubr.bf16.mxu1 %v754_v13  ;;  %v755_v24 = vld [vmem:[%s1085_s0 + $0x24] ss:$8 sps:$4 sm:$0xff]   ;;  %v757_v26 = vld [vmem:[%s1085_s0 + $0x20] ss:$8 sps:$4 sm:$0xff]   ;;  %v761_v28 = vld [vmem:[%s1085_s0 + $0x34] ss:$8 sps:$4 sm:$0xff]  }
   0xa   :  { %v764_v25 = vld [vmem:[%s1085_s0 + $0x64] ss:$8 sps:$4 sm:$0xff]   ;;  %v766_v27 = vld [vmem:[%s1085_s0 + $0x60] ss:$8 sps:$4 sm:$0xff]   ;;  %v767_v29 = vld [vmem:[%s1085_s0 + $0x74] ss:$8 sps:$4 sm:$0xff]  }
   0xb   :  { %654 = vmatpush3.bf16.msra.mxu0 %v735_v5  ;;  %723 = vmatpush3.bf16.msra.mxu1 %v735_v5  ;;  %v763_v30 = vld [vmem:[%s1085_s0 + $0x30] ss:$8 sps:$4 sm:$0xff]  }
   0xc   :  { %655 = vmatprep.subr.bf16.mxu0 %v736_v6  ;;  %716 = vmatprep.subr.bf16.mxu1 %v736_v6  ;;  %v769_v31 = vld [vmem:[%s1085_s0 + $0x70] ss:$8 sps:$4 sm:$0xff]  }
   0xf   :  { %656 = vmatpush3.bf16.msra.mxu0 %v737_v7  ;;  %724 = vmatpush3.bf16.msra.mxu1 %v737_v7 }
  0x10   :  { %657 = vmatprep.subr.bf16.mxu0 %v738_v8  ;;  %717 = vmatprep.subr.bf16.mxu1 %v738_v8 }
  0x13   :  { %658 = vmatpush3.bf16.msra.mxu0 %v739_v9  ;;  %725 = vmatpush3.bf16.msra.mxu1 %v739_v9 }
  0x14   :  { %659 = vmatprep.subr.bf16.mxu0 %v740_v10  ;;  %718 = vmatprep.subr.bf16.mxu1 %v740_v10 }
  0x17   :  { %660 = vmatpush3.bf16.msra.mxu0 %v741_v12  ;;  %726 = vmatpush3.bf16.msra.mxu1 %v741_v12 }
  0x18   :  { %661 = vmatprep.subr.bf16.mxu0 %v742_v14  ;;  %719 = vmatprep.subr.bf16.mxu1 %v742_v14 }
  0x1b   :  { %662 = vmatpush3.bf16.msra.mxu0 %v743_v15  ;;  %727 = vmatpush3.bf16.msra.mxu1 %v743_v15 }
  0x1c   :  { %663 = vmatprep.subr.bf16.mxu0 %v744_v16  ;;  %720 = vmatprep.subr.bf16.mxu1 %v744_v16 }
  0x1f   :  { %664 = vmatpush3.bf16.msra.mxu0 %v745_v17  ;;  %728 = vmatpush3.bf16.msra.mxu1 %v745_v17 }
  0x22   :  { %275 = vmatmul.mubr.bf16.vlgmr.msra.gmra.mxu0 %v746_v18  ;;  %307 = vmatmul.mubr.bf16.vlgmr.msra.gmra.mxu1 %v752_v19 }
  0x23   :  { %282 = vmatprep.mubr.bf16.mxu0 %v749_v20  ;;  %314 = vmatprep.mubr.bf16.mxu1 %v758_v21 }
  0x2a   :  { %283 = vmatmul.mubr.bf16.gmra.mxu0 %v751_v22  ;;  %315 = vmatmul.mubr.bf16.gmra.mxu1 %v760_v23 }
  0x2b   :  { %290 = vmatprep.mubr.bf16.mxu0 %v755_v24  ;;  %322 = vmatprep.mubr.bf16.mxu1 %v764_v25 }
  0x32   :  { %291 = vmatmul.mubr.bf16.gmra.mxu0 %v757_v26  ;;  %323 = vmatmul.mubr.bf16.gmra.mxu1 %v766_v27 }
  0x33   :  { %298 = vmatprep.mubr.bf16.mxu0 %v761_v28  ;;  %330 = vmatprep.mubr.bf16.mxu1 %v767_v29 }
  0x3a   :  { %299 = vmatmul.mubr.bf16.gmra.mxu0 %v763_v30  ;;  %331 = vmatmul.mubr.bf16.gmra.mxu1 %v769_v31 }
  0xe2   :  { %v665_v32 = vpop.f32.mrf.mxu0  ;;  %v689_v33 = vpop.f32.mrf.mxu1 }
  0xe4   :  { %v666_v34 = vpop.f32.mrf.mxu0  ;;  %v690_v35 = vpop.f32.mrf.mxu1 }
  0xe5   :  { %v902_v47 = vadd.f32 %v666_v34, %v665_v32  ;;  %v951_v27 = vadd.f32 %v690_v35, %v689_v33 }
  0xe6   :  { %v668_v36 = vpop.f32.mrf.mxu0  ;;  %v692_v37 = vpop.f32.mrf.mxu1 }
  0xe7   :  { %v378_v55 = vmul.f32 %v902_v47, %v902_v47  ;;  %v340_v63 = vsel %vm339_vm0, %v902_v47, 0.0 }
  0xe8   :  { %v669_v38 = vpop.f32.mrf.mxu0  ;;  %v693_v39 = vpop.f32.mrf.mxu1 }
  0xe9   :  { %v900_v46 = vadd.f32 %v669_v38, %v668_v36  ;;  %v394_v3 = vsel %vm339_vm0, %v378_v55, 0.0  ;;  %v958_v36 = vadd.f32 %v693_v39, %v692_v37  ;;  %v355_v55 = vsel %vm339_vm0, %v951_v27, 0.0 }
  0xea   :  { %v671_v40 = vpop.f32.mrf.mxu0  ;;  %v894_v41 = vpop.f32.mrf.mxu1 }
  0xeb   :  { %v379_v53 = vmul.f32 %v900_v46, %v900_v46  ;;  %v341_v58 = vsel %vm339_vm0, %v900_v46, 0.0 }
  0xec   :  { %v672_v42 = vpop.f32.mrf.mxu0  ;;  %v896_v43 = vpop.f32.mrf.mxu1  ;;  %v342_v4 = vadd.f32 %v341_v58, %v340_v63 }
  0xed   :  { %v906_v50 = vadd.f32 %v672_v42, %v671_v40  ;;  %v395_v0 = vsel %vm339_vm0, %v379_v53, 0.0 }
  0xee   :  { %v674_v44 = vpop.f32.mrf.mxu0  ;;  %v898_v45 = vpop.f32.mrf.mxu1  ;;  %v396_v10 = vadd.f32 %v395_v0, %v394_v3  ;;  %v357_v0 = vsel %vm339_vm0, %v958_v36, 0.0 }
  0xef   :  { %v380_v59 = vmul.f32 %v906_v50, %v906_v50  ;;  %v343_v1 = vsel %vm339_vm0, %v906_v50, 0.0 }
  0xf0   :  { %v675_v48 = vpop.f32.mrf.mxu0  ;;  %v904_v49 = vpop.f32.mrf.mxu1  ;;  %v344_v11 = vadd.f32 %v343_v1, %v342_v4 }
  0xf1   :  { %v912_v54 = vadd.f32 %v675_v48, %v674_v44  ;;  %v397_v6 = vsel %vm339_vm0, %v380_v59, 0.0  ;;  %v386_v44 = vmul.f32 %v951_v27, %v951_v27  ;;  %v967_v48 = vadd.f32 %v896_v43, %v894_v41 }
  0xf2   :  { %v677_v51 = vpop.f32.mrf.mxu0  ;;  %v908_v52 = vpop.f32.mrf.mxu1  ;;  %v398_v17 = vadd.f32 %v397_v6, %v396_v10  ;;  %v979_v58 = vadd.f32 %v904_v49, %v898_v45 }
  0xf3   :  { %v381_v2 = vmul.f32 %v912_v54, %v912_v54  ;;  %v345_v7 = vsel %vm339_vm0, %v912_v54, 0.0  ;;  %v409_v63 = vsel %vm339_vm0, %v386_v44, 0.0  ;;  %v388_v1 = vmul.f32 %v967_v48, %v967_v48 }
  0xf4   :  { %v678_v56 = vpop.f32.mrf.mxu0  ;;  %v916_v57 = vpop.f32.mrf.mxu1  ;;  %v346_v18 = vadd.f32 %v345_v7, %v344_v11  ;;  %v359_v4 = vsel %vm339_vm0, %v967_v48, 0.0 }
  0xf5   :  { %v922_v60 = vadd.f32 %v678_v56, %v677_v51  ;;  %v399_v14 = vsel %vm339_vm0, %v381_v2, 0.0  ;;  %v387_v56 = vmul.f32 %v958_v36, %v958_v36  ;;  %v989_v2 = vadd.f32 %v916_v57, %v908_v52 }
  0xf6   :  { %v680_v61 = vpop.f32.mrf.mxu0  ;;  %v924_v62 = vpop.f32.mrf.mxu1  ;;  %v400_v23 = vadd.f32 %v399_v14, %v398_v17  ;;  %v413_v11 = vsel %vm339_vm0, %v388_v1, 0.0  ;;  %v361_v52 = vsel %vm339_vm0, %v979_v58, 0.0 }
  0xf7   :  { %v382_v8 = vmul.f32 %v922_v60, %v922_v60  ;;  %v347_v15 = vsel %vm339_vm0, %v922_v60, 0.0  ;;  %v411_v49 = vsel %vm339_vm0, %v387_v56, 0.0  ;;  %v390_v57 = vmul.f32 %v989_v2, %v989_v2 }
  0xf8   :  { %v681_v5 = vpop.f32.mrf.mxu0  ;;  %v705_v13 = vpop.f32.mrf.mxu1  ;;  %v348_v24 = vadd.f32 %v347_v15, %v346_v18 }
  0xf9   :  { %v939_v9 = vadd.f32 %v681_v5, %v680_v61  ;;  %v401_v20 = vsel %vm339_vm0, %v382_v8, 0.0  ;;  %v389_v5 = vmul.f32 %v979_v58, %v979_v58  ;;  %v997_v6 = vadd.f32 %v705_v13, %v924_v62 }
  0xfa   :  { %v683_v12 = vpop.f32.mrf.mxu0  ;;  %v707_v26 = vpop.f32.mrf.mxu1  ;;  %v402_v31 = vadd.f32 %v401_v20, %v400_v23  ;;  %v363_v62 = vsel %vm339_vm0, %v989_v2, 0.0  ;;  %v417_v20 = vsel %vm339_vm0, %v390_v57, 0.0 }
  0xfb   :  { %v383_v16 = vmul.f32 %v939_v9, %v939_v9  ;;  %v349_v21 = vsel %vm339_vm0, %v939_v9, 0.0  ;;  %v391_v13 = vmul.f32 %v997_v6, %v997_v6 }
  0xfc   :  { %v684_v19 = vpop.f32.mrf.mxu0  ;;  %v350_v32 = vadd.f32 %v349_v21, %v348_v24  ;;  %v708_v35 = vpop.f32.mrf.mxu1  ;;  %v365_v21 = vsel %vm339_vm0, %v997_v6, 0.0 }
  0xfd   :  { %v949_v22 = vadd.f32 %v684_v19, %v683_v12  ;;  %v403_v28 = vsel %vm339_vm0, %v383_v16, 0.0  ;;  %v1004_v12 = vadd.f32 %v708_v35, %v707_v26  ;;  %v415_v16 = vsel %vm339_vm0, %v389_v5, 0.0 }
  0xfe   :  { %v686_v25 = vpop.f32.mrf.mxu0  ;;  %v404_v42 = vadd.f32 %v403_v28, %v402_v31  ;;  %v710_v61 = vpop.f32.mrf.mxu1  ;;  %v419_v26 = vsel %vm339_vm0, %v391_v13, 0.0 }
  0xff   :  { %v351_v29 = vsel %vm339_vm0, %v949_v22, 0.0  ;;  %v384_v30 = vmul.f32 %v949_v22, %v949_v22  ;;  %v392_v23 = vmul.f32 %v1004_v12, %v1004_v12  ;;  %v367_v28 = vsel %vm339_vm0, %v1004_v12, 0.0 }
 0x100   :  { %v687_v34 = vpop.f32.mrf.mxu0  ;;  %v352_v33 = vadd.f32 %v351_v29, %v350_v32  ;;  %v711_v10 = vpop.f32.mrf.mxu1 }
 0x101   :  { %v405_v38 = vsel %vm339_vm0, %v384_v30, 0.0  ;;  %v961_v40 = vadd.f32 %v687_v34, %v686_v25  ;;  %v712_v17 = vadd.f32 %v711_v10, %v710_v61  ;;  %v421_v32 = vsel %vm339_vm0, %v392_v23, 0.0 }
 0x102   :  { %v406_v39 = vadd.f32 %v405_v38, %v404_v42 }
 0x103   :  { %v353_v51 = vsel %vm339_vm0, %v961_v40, 0.0  ;;  %v385_v37 = vmul.f32 %v961_v40, %v961_v40  ;;  %v393_v29 = vmul.f32 %v712_v17, %v712_v17  ;;  %v369_v34 = vsel %vm339_vm0, %v712_v17, 0.0 }
 0x104   :  { %v354_v53 = vadd.f32 %v353_v51, %v352_v33 }
 0x105   :  { %v407_v41 = vsel %vm339_vm0, %v385_v37, 0.0  ;;  %v423_v33 = vsel %vm339_vm0, %v393_v29, 0.0 }
 0x106   :  { %v356_v43 = vadd.f32 %v355_v55, %v354_v53  ;;  %v408_v59 = vadd.f32 %v407_v41, %v406_v39 }
 0x108   :  { %v358_v3 = vadd.f32 %v357_v0, %v356_v43  ;;  %v410_v45 = vadd.f32 %v409_v63, %v408_v59 }
 0x10a   :  { %v412_v7 = vadd.f32 %v411_v49, %v410_v45  ;;  %v360_v8 = vadd.f32 %v359_v4, %v358_v3  ;;  %v441_v4 = vlaneseq }
 0x10c   :  { %v362_v14 = vadd.f32 %v361_v52, %v360_v8  ;;  %v414_v15 = vadd.f32 %v413_v11, %v412_v7  ;;  %v1022_v5 = vshrl.u32 %v441_v4, 7  ;;  %v436_v7 = vld [vmem:[%s1086_s2] sm:$0x1]  ;;  %s772_s2 = smov 64  }
 0x10e   :  { %v364_v18 = vadd.f32 %v363_v62, %v362_v14  ;;  %v416_v19 = vadd.f32 %v415_v16, %v414_v15  ;;  %v443_v8 = vsub.s32 0, %v1022_v5  ;;  %v517_v11 = vadd.s32 8, %v1022_v5  ;;  %v438_v15 = vld [vmem:[%s1087_s3] sm:$0x1] }
 0x10f   :  { %v1030_v52 = vadd.s32 24, %v1022_v5  ;;  %v1033_v57 = vadd.s32 16, %v1022_v5 }
 0x110   :  { %v366_v24 = vadd.f32 %v365_v21, %v364_v18  ;;  %v418_v25 = vadd.f32 %v417_v20, %v416_v19  ;;  %v531_v13 = vand.u32 3, %v517_v11  ;;  %v524_v19 = vand.u32 3, %v1022_v5 }
 0x111   :  { %v545_v18 = vand.u32 3, %v1030_v52  ;;  %v538_v20 = vand.u32 3, %v1033_v57 }
 0x112   :  { %v420_v30 = vadd.f32 %v419_v26, %v418_v25  ;;  %v368_v31 = vadd.f32 %v367_v28, %v366_v24  ;;  %vm1054_vm2 = vcmp.eq.s32.totalorder %v531_v13, 0  ;;  %vm1060_vm3 = vcmp.eq.s32.totalorder %v524_v19, 0 }
 0x113   :  { %vm571_vm4 = vcmp.eq.s32.totalorder %v545_v18, 0  ;;  %vm570_vm5 = vcmp.eq.s32.totalorder %v538_v20, 0 }
 0x114   :  { %v422_v38 = vadd.f32 %v421_v32, %v420_v30  ;;  %v370_v42 = vadd.f32 %v369_v34, %v368_v31 }
 0x116   :  { %v371_v35 = vrot.slane %v370_v42, 4  ;;  %v424_v44 = vadd.f32 %v423_v33, %v422_v38 }
 0x118   :  { %v372_v51 = vadd.f32 %v371_v35, %v370_v42  ;;  %v425_v37 = vrot.slane %v424_v44, 4 }
 0x11a   :  { %v373_v39 = vrot.slane %v372_v51, 2  ;;  %v426_v53 = vadd.f32 %v425_v37, %v424_v44 }
 0x11c   :  { %v374_v55 = vadd.f32 %v373_v39, %v372_v51  ;;  %v427_v56 = vrot.slane %v426_v53, 2 }
 0x11e   :  { %v375_v41 = vrot.slane %v374_v55, 1  ;;  %v428_v43 = vadd.f32 %v427_v56, %v426_v53 }
 0x120   :  { %v376_v59 = vadd.f32 %v375_v41, %v374_v55  ;;  %v429_v61 = vrot.slane %v428_v43, 1 }
 0x122   :  { %v377_v63 = vmul.f32 0.0078125, %v376_v59  ;;  %v430_v0 = vadd.f32 %v429_v61, %v428_v43 }
 0x124   :  { %v431_v1 = vmul.f32 0.0078125, %v430_v0  ;;  %v432_v3 = vmul.f32 %v377_v63, %v377_v63 }
 0x126   :  { %v433_v45 = vsub.f32 %v431_v1, %v432_v3 }
 0x128   :  { %v434_v49 = vadd.f32 1e-05, %v433_v45 }
 0x12a   :  { %770 = vrsqrt.f32 %v434_v49 }
 0x137   :  { %v771_v10 = vpop.eup %770 }
 0x138   :  { %v437_v14 = vmul.f32 %v771_v10, %v436_v7 }
 0x13a   :  { %v439_v16 = vmul.f32 %v437_v14, %v377_v63  ;;  %v444_v62 = vrot.slane %v437_v14, %v443_v8 }
 0x13c   :  { %v440_v21 = vsub.f32 %v438_v15, %v439_v16  ;;  %v456_v23 = vmul.f32 %v979_v58, %v444_v62  ;;  %v460_v24 = vmul.f32 %v712_v17, %v444_v62  ;;  %v445_v25 = vmul.f32 %v902_v47, %v444_v62 }
 0x13d   :  { %v446_v26 = vmul.f32 %v900_v46, %v444_v62  ;;  %v449_v28 = vmul.f32 %v922_v60, %v444_v62  ;;  %v450_v29 = vmul.f32 %v939_v9, %v444_v62  ;;  %v453_v30 = vmul.f32 %v951_v27, %v444_v62 }
 0x13e   :  { %v465_v31 = vrot.slane %v440_v21, %v443_v8  ;;  %v454_v32 = vmul.f32 %v958_v36, %v444_v62  ;;  %v457_v34 = vmul.f32 %v989_v2, %v444_v62  ;;  %v458_v38 = vmul.f32 %v997_v6, %v444_v62 }
 0x13f   :  { %v447_v58 = vmul.f32 %v906_v50, %v444_v62  ;;  %v448_v17 = vmul.f32 %v912_v54, %v444_v62  ;;  %v451_v47 = vmul.f32 %v949_v22, %v444_v62  ;;  %v452_v46 = vmul.f32 %v961_v40, %v444_v62 }
 0x140   :  { %v478_v60 = vadd.f32 %v465_v31, %v456_v23  ;;  %v482_v42 = vadd.f32 %v465_v31, %v460_v24  ;;  %v468_v9 = vadd.f32 %v465_v31, %v446_v26  ;;  %v471_v33 = vadd.f32 %v465_v31, %v449_v28 }
 0x141   :  { %v472_v27 = vadd.f32 %v465_v31, %v450_v29  ;;  %v475_v35 = vadd.f32 %v465_v31, %v453_v30  ;;  %v476_v44 = vadd.f32 %v465_v31, %v454_v32  ;;  %v479_v36 = vadd.f32 %v465_v31, %v457_v34 }
 0x142   :  { %v494_v2 = vmax.f32 %v478_v60, 0.0  ;;  %v498_v51 = vmax.f32 %v482_v42, 0.0  ;;  %v480_v6 = vadd.f32 %v465_v31, %v458_v38  ;;  %v484_v37 = vmax.f32 %v468_v9, 0.0 }
 0x143   :  { %v487_v54 = vmax.f32 %v471_v33, 0.0  ;;  %v488_v22 = vmax.f32 %v472_v27, 0.0  ;;  %v491_v40 = vmax.f32 %v475_v35, 0.0  ;;  %v492_v39 = vmax.f32 %v476_v44, 0.0 }
 0x144   :  { %v510_v53 = vmax.f32 %v494_v2, %v498_v51  ;;  %v495_v55 = vmax.f32 %v479_v36, 0.0  ;;  %v496_v56 = vmax.f32 %v480_v6, 0.0  ;;  %v467_v41 = vadd.f32 %v465_v31, %v445_v25 }
 0x145   :  { %v500_v43 = vmax.f32 %v484_v37, %v488_v22  ;;  %v455_v59 = vmul.f32 %v967_v48, %v444_v62  ;;  %v459_v61 = vmul.f32 %v1004_v12, %v444_v62  ;;  %v469_v63 = vadd.f32 %v465_v31, %v447_v58 }
 0x146   :  { %v507_v0 = vmax.f32 %v491_v40, %v495_v55  ;;  %v508_v1 = vmax.f32 %v492_v39, %v496_v56  ;;  %v483_v3 = vmax.f32 %v467_v41, 0.0  ;;  %v470_v45 = vadd.f32 %v465_v31, %v448_v17 }
 0x147   :  { %v504_v49 = vmax.f32 %v500_v43, %v487_v54  ;;  %v473_v4 = vadd.f32 %v465_v31, %v451_v47  ;;  %v474_v5 = vadd.f32 %v465_v31, %v452_v46  ;;  %v477_v7 = vadd.f32 %v465_v31, %v455_v59 }
 0x148   :  { %v511_v8 = vmax.f32 %v507_v0, 0.0  ;;  %v512_v10 = vmax.f32 %v508_v1, %v495_v55  ;;  %v499_v11 = vmax.f32 %v483_v3, %v487_v54  ;;  %v481_v14 = vadd.f32 %v465_v31, %v459_v61 }
 0x149   :  { %v485_v15 = vmax.f32 %v469_v63, 0.0  ;;  %v486_v16 = vmax.f32 %v470_v45, 0.0  ;;  %v489_v13 = vmax.f32 %v473_v4, 0.0  ;;  %v490_v21 = vmax.f32 %v474_v5, 0.0 }
 0x14a   :  { %v577_v48 = vrot.slane %v511_v8, 7  ;;  %v578_v23 = vrot.slane %v512_v10, 7  ;;  %v503_v12 = vmax.f32 %v499_v11, 0.0  ;;  %v493_v24 = vmax.f32 %v477_v7, 0.0 }
 0x14b   :  { %v497_v25 = vmax.f32 %v481_v14, 0.0  ;;  %v501_v26 = vmax.f32 %v485_v15, %v489_v13  ;;  %v502_v28 = vmax.f32 %v486_v16, %v490_v21  ;;  %v594_v30 = vmax.f32 %v504_v49, %v512_v10 }
 0x14c   :  { %v579_v29 = vsel %vm576_vm1, %v577_v48, %v578_v23  ;;  %v588_v31 = vsel %vm576_vm1, 0.0, %v577_v48  ;;  %v593_v32 = vmax.f32 %v503_v12, %v511_v8 }
 0x14d   :  { %v590_v34 = vsel %vm1054_vm2, 0.0, %v579_v29  ;;  %v506_v38 = vmax.f32 %v502_v28, %v489_v13  ;;  %v509_v58 = vmax.f32 %v493_v24, %v497_v25  ;;  %v514_v17 = vmax.f32 %v510_v53, %v497_v25 }
 0x14e   :  { %v598_v19 = vmax.f32 %v594_v30, %v590_v34  ;;  %v589_v47 = vsel %vm1060_vm3, 0.0, %v588_v31  ;;  %v505_v46 = vmax.f32 %v501_v26, %v488_v22 }
 0x14f   :  { %v513_v60 = vmax.f32 %v509_v58, %v496_v56  ;;  %v582_v42 = vrot.slane %v514_v17, 7  ;;  %v597_v9 = vmax.f32 %v593_v32, %v589_v47  ;;  %v596_v44 = vmax.f32 %v506_v38, %v514_v17 }
 0x150   :  { %602 = vrot.lane.b32.xlu0 %v598_v19, %s772_s2 }
 0x151   :  { %v580_v33 = vrot.slane %v513_v60, 7  ;;  %v595_v27 = vmax.f32 %v505_v46, %v513_v60 }
 0x153   :  { %v583_v35 = vsel %vm576_vm1, %v580_v33, %v582_v42  ;;  %v581_v36 = vsel %vm576_vm1, %v578_v23, %v580_v33 }
 0x154   :  { %v592_v2 = vsel %vm571_vm4, 0.0, %v583_v35  ;;  %v591_v51 = vsel %vm570_vm5, 0.0, %v581_v36 }
 0x155   :  { %v600_v6 = vmax.f32 %v596_v44, %v592_v2  ;;  %v599_v37 = vmax.f32 %v595_v27, %v591_v51 }
 0x157   :  { %606 = vrot.lane.b32.xlu0 %v600_v6, %s772_s2 }
 0x1c2   :  { %v603_v50 = vpop.permute.xlu0 %602 }
 0x1c3   :  { %v609_v54 = vsel %vm339_vm0, %v597_v9, %v603_v50 }
 0x1c4   :  { %611 = vst [vmem:[%s1088_s4] sm:$0xff] %v609_v54 }
 0x1c9   :  { %v607_v52 = vpop.permute.xlu0 %606 }
 0x1ca   :  { %v610_v57 = vsel %vm339_vm0, %v599_v37, %v607_v52 }
 0x1cb   :  { %612 = vst [vmem:[%s1088_s4 + $0x8] sm:$0xff] %v610_v57 }

</bundles_post_ra>
